<compile_context>
chip_gen: v7x
topology: tpu7x:2x2x1
jax: 0.10.0
libtpu: 0.0.40
codegen_flags: <defaults>
</compile_context>

<pallas_src>
import functools
import jax
import jax.numpy as jnp
from jax.experimental import pallas as pl
from jax.experimental.pallas import tpu as pltpu


# ----------------------------------------------------------------------------- utils
def _round_up(x, m):
    return (x + m - 1) // m * m


def _vmem_limit(footprint_bytes):
    # ~2x the double-buffered tile footprint, clamped to a range that is safe on
    # every generation (>= v5e's 16 MiB scoped default, < v7x's 64 MiB physical).
    return int(min(max(2 * footprint_bytes + (4 << 20), 16 << 20), 48 << 20))


def _pick_tn(n):
    np_ = _round_up(n, 128)
    if np_ >= 1024 and np_ % 512 == 0:
        return 512                      # wide, lane-dense stores; >=2 blocks on v7x
    if np_ >= 256 and np_ % 256 == 0:
        return 256                      # matches the 256-wide MXU on v6e/v7x
    return 128


def _pick_tk(k):
    kp = _round_up(k, 128)
    if kp <= 1024:
        return kp                       # single K step (all 1x1 convs, conv1)
    if kp % 256 == 0:
        return 256
    return 128


# ----------------------------------------------------------------------------- Pallas kernels
def _epilogue(y_f32, sb_ref, r_ref, relu, out_dtype):
    y = y_f32 * sb_ref[0:1, :] + sb_ref[1:2, :]
    if r_ref is not None:
        y = y + r_ref[...].astype(jnp.float32)
    if relu:
        y = jnp.maximum(y, 0.0)
    return y.astype(out_dtype)


# --- single K step (no accumulator scratch needed) ---
def _mm_bn_kernel_1k(x_ref, w_ref, sb_ref, o_ref, *, relu):
    y = jnp.dot(x_ref[...], w_ref[...], preferred_element_type=jnp.float32)
    o_ref[...] = _epilogue(y, sb_ref, None, relu, o_ref.dtype)


def _mm_bn_res_kernel_1k(x_ref, w_ref, sb_ref, r_ref, o_ref, *, relu):
    y = jnp.dot(x_ref[...], w_ref[...], preferred_element_type=jnp.float32)
    o_ref[...] = _epilogue(y, sb_ref, r_ref, relu, o_ref.dtype)


# --- multi K step (f32 VMEM accumulator, init/finalize via pl.when) ---
def _mm_bn_kernel_nk(x_ref, w_ref, sb_ref, o_ref, acc_ref, *, relu):
    k = pl.program_id(2)

    @pl.when(k == 0)
    def _():
        acc_ref[...] = jnp.zeros_like(acc_ref)

    acc_ref[...] += jnp.dot(x_ref[...], w_ref[...],
                            preferred_element_type=jnp.float32)

    @pl.when(k == pl.num_programs(2) - 1)
    def _():
        o_ref[...] = _epilogue(acc_ref[...], sb_ref, None, relu, o_ref.dtype)


def _mm_bn_res_kernel_nk(x_ref, w_ref, sb_ref, r_ref, o_ref, acc_ref, *, relu):
    k = pl.program_id(2)

    @pl.when(k == 0)
    def _():
        acc_ref[...] = jnp.zeros_like(acc_ref)

    acc_ref[...] += jnp.dot(x_ref[...], w_ref[...],
                            preferred_element_type=jnp.float32)

    @pl.when(k == pl.num_programs(2) - 1)
    def _():
        o_ref[...] = _epilogue(acc_ref[...], sb_ref, r_ref, relu, o_ref.dtype)


def _maxpool_kernel(p_ref, o_ref):
    # p_ref: [KK, TM, C] -> elementwise max over the KK window positions (VPU)
    kk = p_ref.shape[0]
    m = p_ref[0]
    for i in range(1, kk):
        m = jnp.maximum(m, p_ref[i])
    o_ref[...] = m


# ----------------------------------------------------------------------------- fused conv-as-matmul
def fused_matmul_bn(x, w, scale, bias, residual=None, relu=True,
                    out_dtype=jnp.bfloat16):
    """out = act((x @ w) * scale + bias [+ residual]);  x:[M,K], w:[K,N], bf16 MXU."""
    M, K = x.shape
    K2, N = w.shape
    assert K2 == K

    TN = _pick_tn(N)
    TK = _pick_tk(K)
    TM = min(512, _round_up(M, 8))
    Mp, Kp, Np = _round_up(M, TM), _round_up(K, TK), _round_up(N, TN)
    nk = Kp // TK

    xp = jnp.pad(x.astype(jnp.bfloat16), ((0, Mp - M), (0, Kp - K)))
    wp = jnp.pad(w.astype(jnp.bfloat16), ((0, Kp - K), (0, Np - N)))
    # scale/bias packed into a single (2, Np) f32 slab -> one BlockSpec.
    sb = jnp.stack([jnp.pad(scale.astype(jnp.float32), (0, Np - N)),
                    jnp.pad(bias.astype(jnp.float32), (0, Np - N))], axis=0)

    has_res = residual is not None
    if has_res:
        rp = jnp.pad(residual.astype(jnp.bfloat16), ((0, Mp - M), (0, Np - N)))

    # VMEM budget estimate (double-buffered inputs/outputs + f32 accumulator).
    footprint = 2 * (TM * TK * 2 + TK * TN * 2 + TM * TN * 2 + 2 * TN * 4)
    if has_res:
        footprint += 2 * TM * TN * 2
    if nk > 1:
        footprint += TM * TN * 4

    if nk == 1:
        grid = (Mp // TM, Np // TN)
        in_specs = [
            pl.BlockSpec((TM, TK), lambda i, j: (i, 0)),
            pl.BlockSpec((TK, TN), lambda i, j: (0, j)),
            pl.BlockSpec((2, TN), lambda i, j: (0, j)),
        ]
        args = [xp, wp, sb]
        if has_res:
            in_specs.append(pl.BlockSpec((TM, TN), lambda i, j: (i, j)))
            args.append(rp)
            kernel = functools.partial(_mm_bn_res_kernel_1k, relu=relu)
        else:
            kernel = functools.partial(_mm_bn_kernel_1k, relu=relu)
        out_specs = pl.BlockSpec((TM, TN), lambda i, j: (i, j))
        scratch = []
        dims = ("parallel", "parallel")
    else:
        grid = (Mp // TM, Np // TN, nk)
        in_specs = [
            pl.BlockSpec((TM, TK), lambda i, j, k: (i, k)),
            pl.BlockSpec((TK, TN), lambda i, j, k: (k, j)),
            pl.BlockSpec((2, TN), lambda i, j, k: (0, j)),
        ]
        args = [xp, wp, sb]
        if has_res:
            in_specs.append(pl.BlockSpec((TM, TN), lambda i, j, k: (i, j)))
            args.append(rp)
            kernel = functools.partial(_mm_bn_res_kernel_nk, relu=relu)
        else:
            kernel = functools.partial(_mm_bn_kernel_nk, relu=relu)
        out_specs = pl.BlockSpec((TM, TN), lambda i, j, k: (i, j))
        scratch = [pltpu.VMEM((TM, TN), jnp.float32)]
        dims = ("parallel", "parallel", "arbitrary")

    out = pl.pallas_call(
        kernel,
        out_shape=jax.ShapeDtypeStruct((Mp, Np), out_dtype),
        grid_spec=pltpu.PrefetchScalarGridSpec(
            num_scalar_prefetch=0,
            grid=grid,
            in_specs=in_specs,
            out_specs=out_specs,
            scratch_shapes=scratch,
        ),
        compiler_params=pltpu.CompilerParams(
            dimension_semantics=dims,
            vmem_limit_bytes=_vmem_limit(footprint)),
    )(*args)
    return out[:M, :N]


def _extract_patches(x, kh, kw, stride, pad):
    """x: [N,H,W,C] NHWC -> ([N*Ho*Wo, kh*kw*C], (N,Ho,Wo)); zero padding."""
    N, H, W, C = x.shape
    if pad > 0:
        x = jnp.pad(x, ((0, 0), (pad, pad), (pad, pad), (0, 0)))
    Hp, Wp = H + 2 * pad, W + 2 * pad
    Ho = (Hp - kh) // stride + 1
    Wo = (Wp - kw) // stride + 1
    if kh == 1 and kw == 1 and stride == 1:
        return x.reshape(N * Ho * Wo, C), (N, Ho, Wo)   # pure reshape, no copy blow-up
    cols = []
    for i in range(kh):
        for j in range(kw):
            cols.append(x[:, i:i + stride * Ho:stride,
                          j:j + stride * Wo:stride, :])
    # TODO(synk): fuse patch extraction into the matmul pipeline (halo BlockSpec /
    # in-kernel shifted accumulation) to avoid the kh*kw HBM duplication for
    # 3x3/7x7 convs; bf16 activations halve the cost in the meantime.
    patches = jnp.concatenate(cols, axis=-1)   # [N,Ho,Wo, kh*kw*C] (kh,kw,C order)
    return patches.reshape(N * Ho * Wo, kh * kw * C), (N, Ho, Wo)


def conv_bn(x, w, scale, bias, stride=1, pad=0, relu=True, residual=None):
    """x: NHWC (bf16), w: [kh,kw,Cin,Cout]; returns NHWC bf16."""
    kh, kw, cin, cout = w.shape
    patches, (N, Ho, Wo) = _extract_patches(x, kh, kw, stride, pad)
    wmat = w.reshape(kh * kw * cin, cout)
    res = None
    if residual is not None:
        res = residual.reshape(N * Ho * Wo, cout)
    out = fused_matmul_bn(patches, wmat, scale, bias, residual=res, relu=relu)
    return out.reshape(N, Ho, Wo, cout)


def maxpool2d(x, ksize, stride, pad):
    """x: NHWC max pool, -max_finite padding (matches PyTorch for these configs)."""
    N, H, W, C = x.shape
    neg = float(jnp.finfo(x.dtype).min)
    if pad > 0:
        x = jnp.pad(x, ((0, 0), (pad, pad), (pad, pad), (0, 0)),
                    constant_values=neg)
    Hp, Wp = H + 2 * pad, W + 2 * pad
    Ho = (Hp - ksize) // stride + 1
    Wo = (Wp - ksize) // stride + 1
    views = []
    for i in range(ksize):
        for j in range(ksize):
            views.append(x[:, i:i + stride * Ho:stride,
                           j:j + stride * Wo:stride, :])
    kk = ksize * ksize
    M = N * Ho * Wo
    p = jnp.stack(views, axis=0).reshape(kk, M, C)
    # TODO(synk): slice the padded activation inside the kernel (halo) instead of
    # materializing the kk shifted copies in HBM.

    # Fold rows into lanes when C < 128 so every load/store is lane-dense
    # (elementwise max is layout-agnostic, the reshape is exact).
    f = 128 // C if (C < 128 and 128 % C == 0) else 1
    Cf = C * f
    Mf = -(-M // f)
    TMf = min(512, _round_up(Mf, 8))
    Mpf = _round_up(Mf, TMf)
    Mp = Mpf * f
    p = jnp.pad(p, ((0, 0), (0, Mp - M), (0, 0)), constant_values=neg)
    p = p.reshape(kk, Mpf, Cf)

    footprint = 2 * (kk * TMf * Cf + TMf * Cf) * 2  # bf16, double-buffered
    out = pl.pallas_call(
        _maxpool_kernel,
        out_shape=jax.ShapeDtypeStruct((Mpf, Cf), x.dtype),
        grid_spec=pltpu.PrefetchScalarGridSpec(
            num_scalar_prefetch=0,
            grid=(Mpf // TMf,),
            in_specs=[pl.BlockSpec((kk, TMf, Cf), lambda i: (0, i, 0))],
            out_specs=pl.BlockSpec((TMf, Cf), lambda i: (i, 0)),
        ),
        compiler_params=pltpu.CompilerParams(
            dimension_semantics=("parallel",),
            vmem_limit_bytes=_vmem_limit(footprint)),
    )(p)
    return out.reshape(Mp, C)[:M].reshape(N, Ho, Wo, C)


# ----------------------------------------------------------------------------- parameter init (synthetic, deterministic)
def _init_conv(key, kh, kw, cin, cout):
    fan_in = kh * kw * cin
    std = (2.0 / fan_in) ** 0.5
    w = jax.random.normal(key, (kh, kw, cin, cout), jnp.float32) * std
    return w.astype(jnp.bfloat16)      # bf16 weights: MXU-native, half HBM traffic


def _init_bn(key, c, eps=1e-5):
    k1, k2 = jax.random.split(key)
    gamma = 1.0 + 0.01 * jax.random.normal(k1, (c,), jnp.float32)
    beta = 0.01 * jax.random.normal(k2, (c,), jnp.float32)
    mean = jnp.zeros((c,), jnp.float32)
    var = jnp.ones((c,), jnp.float32)
    scale = gamma / jnp.sqrt(var + eps)   # folded BN (inference mode), kept in f32
    bias = beta - mean * scale
    return scale, bias


def init_resnet50_params(key, in_chs):
    keys = iter(jax.random.split(key, 256))

    def nk():
        return next(keys)

    params = {'conv1': {'w': _init_conv(nk(), 7, 7, in_chs, 64),
                        'bn': _init_bn(nk(), 64)}}
    # (mid_channels, out_channels, num_blocks, stride-of-first-block)
    layer_cfg = [(64, 256, 3, 1), (128, 512, 4, 2),
                 (256, 1024, 6, 2), (512, 2048, 3, 2)]
    in_c = 64
    layers = []
    for mid, out_c, nblocks, stride in layer_cfg:
        blocks = []
        for b in range(nblocks):
            s = stride if b == 0 else 1
            blk = {
                'conv1': {'w': _init_conv(nk(), 1, 1, in_c, mid), 'bn': _init_bn(nk(), mid)},
                'conv2': {'w': _init_conv(nk(), 3, 3, mid, mid), 'bn': _init_bn(nk(), mid)},
                'conv3': {'w': _init_conv(nk(), 1, 1, mid, out_c), 'bn': _init_bn(nk(), out_c)},
                'stride': s,
            }
            if b == 0:
                blk['downsample'] = {'w': _init_conv(nk(), 1, 1, in_c, out_c),
                                     'bn': _init_bn(nk(), out_c)}
            blocks.append(blk)
            in_c = out_c
        layers.append(blocks)
    params['layers'] = layers
    return params


# ----------------------------------------------------------------------------- forward pass
def bottleneck_forward(x, blk):
    s = blk['stride']
    out = conv_bn(x, blk['conv1']['w'], *blk['conv1']['bn'],
                  stride=1, pad=0, relu=True)
    # torchvision resnet50 (v1.5): stride on the 3x3 conv
    out = conv_bn(out, blk['conv2']['w'], *blk['conv2']['bn'],
                  stride=s, pad=1, relu=True)
    if 'downsample' in blk:
        identity = conv_bn(x, blk['downsample']['w'], *blk['downsample']['bn'],
                           stride=s, pad=0, relu=False)
    else:
        identity = x
    # conv3 + BN + residual add + ReLU fused in one Pallas kernel
    out = conv_bn(out, blk['conv3']['w'], *blk['conv3']['bn'],
                  stride=1, pad=0, relu=True, residual=identity)
    return out


def resnet50_backbone(images_nchw, params):
    # images: [B, C, H, W] (PyTorch convention) -> NHWC bf16 internally
    x = jnp.transpose(images_nchw, (0, 2, 3, 1)).astype(jnp.bfloat16)
    x = conv_bn(x, params['conv1']['w'], *params['conv1']['bn'],
                stride=2, pad=3, relu=True)
    x = maxpool2d(x, ksize=3, stride=2, pad=1)
    for blocks in params['layers']:
        for blk in blocks:
            x = bottleneck_forward(x, blk)
    # 'last_layer': nn.MaxPool2d(kernel_size=2, stride=2)
    x = maxpool2d(x, ksize=2, stride=2, pad=0)
    # back to NCHW feature map [B, 2048, H/64, W/64], f32 at the network output
    return jnp.transpose(x, (0, 3, 1, 2)).astype(jnp.float32)
    # TODO(synk): device_param is a 0-element convenience parameter in PyTorch; no compute.


# ----------------------------------------------------------------------------- main
if __name__ == "__main__":
    key = jax.random.PRNGKey(0)
    kp, kx = jax.random.split(key)

    in_chs = 3
    # Small spatial size (64x64) keeps everything the architecture requires:
    # /32 downsampling through the ResNet trunk + final /2 maxpool -> 1x1 output.
    images = jax.random.normal(kx, (2, in_chs, 64, 64), jnp.float32)

    params = init_resnet50_params(kp, in_chs)
    feats = resnet50_backbone(images, params)
    feats = jax.block_until_ready(feats)

    assert feats.shape == (2, 2048, 1, 1), feats.shape
    assert bool(jnp.all(jnp.isfinite(feats)))
    print("KERNEL_OK")
</pallas_src>

<mosaic_0001>
module attributes {stable_mosaic.version = 11 : i64} {
  func.func @_mm_bn_kernel_1k(%arg0: i32, %arg1: i32, %arg2: memref<512x256xbf16, #tpu.memory_space<vmem>>, %arg3: memref<256x128xbf16, #tpu.memory_space<vmem>>, %arg4: memref<2x128xf32, #tpu.memory_space<vmem>>, %arg5: memref<512x128xbf16, #tpu.memory_space<vmem>>) attributes {dimension_semantics = [#tpu.dimension_semantics<parallel>, #tpu.dimension_semantics<parallel>], iteration_bounds = array<i64: 4, 1>, scalar_prefetch = 0 : i64, scratch_operands = 0 : i64, tpu.core_type = #tpu.core_type<tc>, window_params = [{transform_indices = @transform_0, window_bounds = array<i64: 512, 256>}, {transform_indices = @transform_1, window_bounds = array<i64: 256, 128>}, {transform_indices = @transform_2, window_bounds = array<i64: 2, 128>}, {transform_indices = @transform_3, window_bounds = array<i64: 512, 128>}]} {
    %c0 = arith.constant 0 : index
    %c0_0 = arith.constant 0 : index
    %0 = vector.load %arg2[%c0, %c0_0] : memref<512x256xbf16, #tpu.memory_space<vmem>>, vector<512x256xbf16>
    %c0_1 = arith.constant 0 : index
    %c0_2 = arith.constant 0 : index
    %1 = vector.load %arg3[%c0_1, %c0_2] : memref<256x128xbf16, #tpu.memory_space<vmem>>, vector<256x128xbf16>
    %cst = arith.constant dense<0.000000e+00> : vector<512x128xf32>
    %2 = tpu.matmul %0, %1, %cst {dimension_numbers = #tpu.dot_dimension_numbers<[1], [0], [0], [1], [0, 0, 1, 1], [], []>} : vector<512x256xbf16>, vector<256x128xbf16>, vector<512x128xf32> -> vector<512x128xf32>
    %c0_3 = arith.constant 0 : index
    %c0_4 = arith.constant 0 : index
    %3 = vector.load %arg4[%c0_3, %c0_4] : memref<2x128xf32, #tpu.memory_space<vmem>>, vector<1x128xf32>
    %4 = vector.broadcast %3 : vector<1x128xf32> to vector<512x128xf32>
    %5 = arith.mulf %2, %4 : vector<512x128xf32>
    %c1 = arith.constant 1 : index
    %c0_5 = arith.constant 0 : index
    %6 = vector.load %arg4[%c1, %c0_5] : memref<2x128xf32, #tpu.memory_space<vmem>>, vector<1x128xf32>
    %7 = vector.broadcast %6 : vector<1x128xf32> to vector<512x128xf32>
    %8 = arith.addf %5, %7 : vector<512x128xf32>
    %cst_6 = arith.constant 0.000000e+00 : f32
    %9 = vector.broadcast %cst_6 : f32 to vector<512x128xf32>
    %10 = arith.maximumf %8, %9 : vector<512x128xf32>
    %11 = arith.truncf %10 : vector<512x128xf32> to vector<512x128xbf16>
    %c0_7 = arith.constant 0 : index
    %c0_8 = arith.constant 0 : index
    %12 = vector.load %arg5[%c0_7, %c0_8] : memref<512x128xbf16, #tpu.memory_space<vmem>>, vector<512x128xbf16>
    tpu.vector_store %arg5[%c0_7, %c0_8], %11 {strides = array<i32>} : memref<512x128xbf16, #tpu.memory_space<vmem>>, vector<512x128xbf16>,
    return
  }
  func.func @transform_0(%arg0: i32, %arg1: i32) -> (i32, i32) {
    %c0_i32 = arith.constant 0 : i32
    %c0_i32_0 = arith.constant 0 : i32
    return %arg0, %c0_i32 : i32, i32
  }
  func.func @transform_1(%arg0: i32, %arg1: i32) -> (i32, i32) {
    %c0_i32 = arith.constant 0 : i32
    %c0_i32_0 = arith.constant 0 : i32
    return %c0_i32, %arg1 : i32, i32
  }
  func.func @transform_2(%arg0: i32, %arg1: i32) -> (i32, i32) {
    %c0_i32 = arith.constant 0 : i32
    %c0_i32_0 = arith.constant 0 : i32
    return %c0_i32, %arg1 : i32, i32
  }
  func.func @transform_3(%arg0: i32, %arg1: i32) -> (i32, i32) {
    %c0_i32 = arith.constant 0 : i32
    return %arg0, %arg1 : i32, i32
  }
}

</mosaic_0001>

<bundles_post_ra>
// kernel: tpu_custom_call.1
= control target key start
LH: loop header
LB: loop body
LE: loop exit
PB: predicated region body
PF: predicated region fallthrough
CT: control target
= control target key end

     0   :  { %8 = vsyncpa [#allocation3], 0  ;;  %s3006_s0 = inlined_call_operand.hbm [shape: bf16[2048,256], index: 0, kind: input, shape index: {}]   ;;  %s3007_s1 = inlined_call_operand.hbm [shape: bf16[256,128], index: 1, kind: input, shape index: {}]   ;;  %s3008_s2 = inlined_call_operand.vmem [shape: f32[2,128], index: 2, kind: input, shape index: {}]   ;;  %s3009_s3 = inlined_call_operand.hbm [shape: bf16[2048,128], index: 3, kind: output, shape index: {}]  }
   0x1   :  { %10 = vsyncpa [#allocation3 + $0x1], 0 }
   0x2   :  { %11 = vsyncpa [#allocation6], 0 }
   0x3   :  { %12 = vsyncpa [#allocation4], 0 }
   0x4   :  { %14 = vsyncpa [#allocation4 + $0x1], 0  ;;  %s2517_s12 = smov 0   ;;  %s2519_s13 = smov 0  }
   0x5   :  { %s2521_s14 = smov 0   ;;  %s2523_s15 = smov 0  }
   0x6   :  { %s2525_s16 = smov 0   ;;  %s2527_s17 = smov 0  }
   0x7 LB: > { %s1694_s18 = sadd.s32 4294967295, %s2485_s17   ;;  %s1695_s19 = sadd.s32 4294967294, %s2485_s17   ;;  %s2485_s17 = sphi %s2527_s17, %s20_s17   ;;  %s2481_s16 = sphi %s2525_s16, %s3032_s16   ;;  %s2477_s15 = sphi %s2523_s15, %s3031_s15   ;;  %s2473_s14 = sphi %s2521_s14, %s3030_s14   ;;  %s2469_s13 = sphi %s2519_s13, %s3029_s13   ;;  %s2465_s12 = sphi %s2517_s12, %s3028_s12  }
   0x8   : > { %p52_p0 = scmp.ne.s32.totalorder %s2469_s13, %s2465_s12  ;;  %p2551_p1 = scmp.eq.s32.totalorder %s1694_s18, 0 }
   0x9   : > { %p2555_p2 = scmp.eq.s32.totalorder %s1694_s18, 3  ;;  %p136_p3 = scmp.eq.s32.totalorder %s1695_s19, 3 }
   0xa   : > { %s3014_s20 = scalar_select %p2551_p1, 1, 0 }
   0xb   : > { %s3015_s21 = scalar_select %p2555_p2, 1, 0 }
   0xc   : > { %p2561_p4 = por %p2551_p1, %p52_p0  ;;  %p1696_p5 = scmp.ge.s32.totalorder %s2485_s17, 1 }
   0xd   : > { %p2566_p6 = por %p136_p3, %p52_p0  ;;  %p143_p7 = scmp.lt.s32.totalorder %s2485_s17, 5 }
   0xe   : > { %s3016_s22 = scalar_select %p2561_p4, 1, 0 }
   0xf   : > { %s3017_s23 = scalar_select %p2566_p6, 1, 0 }
  0x10   : > { %p2571_p8 = pnand %p1696_p5, %p143_p7  ;;  %s2487_s25 = smov [#allocation5]  }
  0x11   : > { %s157_s26 = sshll.u32 %s2487_s25, 4  ;;  %s32_s28 = sadd.s32 1, %s2481_s16  ;;  %s158_s26 = int_to_ptr.vmem [resolvable:$true] %s157_s26 }
  0x12   : > { %s3018_s24 = scalar_select %p2571_p8, 1, 0 }
  0x13   : > { %p2157_p9 = pneg %p2571_p8  ;;  %s2341_s4 = scalar_lea.hbm %s3007_s1, 2048 }
  0x14   : > { %p2342_p11 = scmp.ne.s32.totalorder %s3007_s1, %s2341_s4  ;;  %p2348_p3 = scmp.lt.u32.totalorder %s2341_s4, %s3007_s1 }
  0x15   : > { %p2579_p10 = pnand %p2157_p9, %p2551_p1 }
  0x17   : > { %p2343_p12 = pneg %p2579_p10 }
  0x19   : > { %p2344_p13 = pnand %p2343_p12, %p2342_p11 }
  0x1b   : > { %p2345_p0 = pneg %p2344_p13 }
  0x1d   : > { %p2350_p5 = pnand %p2348_p3, %p2345_p0 }
  0x1f   : > { %2353 = shalt.err (!%p2350_p5)
}
  0x20   : > { %s2354_s9 = scalar_lea.vmem %s158_s26, 2048  ;;  %p2362_p1 = scmp.lt.s32.totalorder %s158_s26, %s158_s26 }
  0x21   : > { %p2355_p7 = scmp.ne.s32.totalorder %s158_s26, %s2354_s9  ;;  %p2363_p4 = scmp.lt.s32.totalorder %s2354_s9, %s2354_s9 }
  0x23   : > { %p2357_p9 = pnand %p2355_p7, %p2343_p12  ;;  %p2364_p8 = por %p2363_p4, %p2362_p1 }
  0x25   : > { %p2358_p6 = pneg %p2357_p9 }
  0x27   : > { %p2365_p2 = pnand %p2364_p8, %p2358_p6 }
  0x29   : > { %2368 = shalt.err (!%p2365_p2)
}
  0x2a   : > { %s2488_s10 = smov 64   ;;  %s2489_s11 = smov 4  }
  0x2b   : > { %2160 = dma.hbm_to_vmem [thread:$0]  (!%p2579_p10), %s3007_s1, 2048, %s158_s26, [#allocation6], %s2488_s10, %s2488_s10, %s2489_s11  }
  0x2c   : > { %p34_p1 = scmp.ge.s32.totalorder %s32_s28, 4  ;;  %s39_s25 = sadd.s32 1, %s2473_s14 }
  0x2d   : > { %p46_p2 = scmp.ne.s32.totalorder %s2473_s14, %s2469_s13  ;;  %p47_p4 = scmp.eq.s32.totalorder %s2485_s17, 0 }
  0x2e   : > { %s3034_s28 = smov (%p34_p1, %s32_s28), 0  ;;  %p3021_p8 = scmp.ne.s32.totalorder %s3015_s21, 0 }
  0x2f   : > { %p2606_p6 = por %p47_p4, %p46_p2  ;;  %s36_s27 = ssub.s32 %s2481_s16, %s3034_s28 }
  0x30   : > { %p2612_p11 = por %p3021_p8, %p46_p2  ;;  %p2170_p12 = scmp.lt.s32.totalorder %s2485_s17, 4 }
  0x31   : > { %p37_p10 = scmp.eq.s32.totalorder %s36_s27, 0  ;;  %s178_s26 = sand.u32 1, %s2473_s14  }
  0x32   : > { %s1700_s4 = sshll.u32 %s178_s26, 9  ;;  %s1860_s6 = sshll.u32 %s2481_s16, 13 }
  0x33   : > { %s2621_s5 = scalar_select %p37_p10, %s2473_s14, %s39_s25  }
  0x34   : > { %s2627_s9 = scalar_lea.hbm %s3006_s0, %s1860_s6  ;;  %s182_s21 = scalar_lea.vmem [#allocation2], %s1700_s4 }
  0x35   : > { %s190_s10 = sshll.u32 %s182_s21, 4  ;;  %p2633_p13 = pnand %p2170_p12, %p2606_p6  ;;  %s2629_s10 = int_to_ptr.vmem [resolvable:$true] %s190_s10 }
  0x36   : > { %s2637_s18 = scalar_lea.sflag [#allocation3], %s178_s26  ;;  %s2369_s19 = scalar_lea.hbm %s2627_s9, 8192 }
  0x37   : > { %p2370_p0 = scmp.ne.s32.totalorder %s2627_s9, %s2369_s19  ;;  %p2371_p3 = pneg %p2633_p13 }
  0x38   : > { %s2374_s29 = scalar_lea.hbm %s3006_s0, 32768  ;;  %p2375_p9 = scmp.lt.u32.totalorder %s2627_s9, %s3006_s0 }
  0x39   : > { %p2372_p5 = pnand %p2371_p3, %p2370_p0  ;;  %p2376_p1 = scmp.lt.u32.totalorder %s2374_s29, %s2369_s19 }
  0x3a   : > { %p2378_p4 = scmp.lt.u32.totalorder %s2369_s19, %s2627_s9 }
  0x3b   : > { %p2373_p7 = pneg %p2372_p5  ;;  %p2377_p2 = por %p2376_p1, %p2375_p9 }
  0x3d   : > { %p2379_p6 = por %p2378_p4, %p2377_p2 }
  0x3f   : > { %p2380_p8 = pnand %p2379_p6, %p2373_p7 }
  0x41   : > { %2383 = shalt.err (!%p2380_p8)
}
  0x42   : > { %s2384_s26 = scalar_lea.vmem %s2629_s10, 8192  ;;  %s2490_s7 = smov [#allocation2]  }
  0x43   : > { %p2385_p12 = scmp.ne.s32.totalorder %s2629_s10, %s2384_s26  ;;  %s2389_s8 = sshll.u32 %s2490_s7, 4  ;;  %s2390_s8 = int_to_ptr.vmem [resolvable:$false] %s2389_s8 }
  0x44   : > { %s2391_s21 = scalar_lea.vmem %s2390_s8, 16384  ;;  %p2392_p5 = scmp.lt.s32.totalorder %s2629_s10, %s2390_s8 }
  0x45   : > { %p2387_p10 = pnand %p2385_p12, %p2371_p3  ;;  %p2393_p9 = scmp.lt.s32.totalorder %s2391_s21, %s2384_s26 }
  0x47   : > { %p2388_p0 = pneg %p2387_p10  ;;  %p2394_p1 = por %p2393_p9, %p2392_p5 }
  0x49   : > { %p2395_p2 = pnand %p2394_p1, %p2388_p0 }
  0x4b   : > { %2398 = shalt.err (!%p2395_p2)
}
  0x4c   : > { %s2491_s19 = smov 128   ;;  %s2492_s25 = smov 8  }
  0x4d   : > { %2164 = dma.hbm_to_vmem [thread:$0]  (!%p2633_p13), %s2627_s9, 8192, %s2629_s10, %s2637_s18, %s2491_s19, %s2491_s19, %s2492_s25  }
  0x4e   : > { %p3024_p3 = scmp.ne.s32.totalorder %s3018_s24, 0 }
  0x4f   : > { %s2668_s27 = sand.u32 (!%p3024_p3), 1, %s2469_s13   ;;  %p3025_p7 = scmp.ne.s32.totalorder (!%p3024_p3), %s3016_s22, 0 }
  0x50   : > { %202 = sbr.rel (%p3024_p3) target bundleno = 514 (0x202), region = 32  ;;  %s1705_s29 = sshll.u32 (!%p3024_p3), %s2668_s27, 9 }
  0x51   : > { %s205_s4 = scalar_lea.sflag (!%p3024_p3), [#allocation3], %s2668_s27  ;;  %s2672_s6 = scalar_lea.vmem (!%p3024_p3), [#allocation2], %s1705_s29 }
  0x57   : > { %2452 = dma.done.wait (%p3025_p7), %s205_s4, 8192  }
  0x58   : > { %2454 = vsyncadd (%p3025_p7), %s205_s4, 4294959104  ;;  %p3026_p13 = scmp.ne.s32.totalorder %s3014_s20, 0 }
  0x5a   : > { %2456 = dma.done.wait (%p3026_p13), [#allocation6], 2048  }
  0x5b   : > { %2458 = vsyncadd (%p3026_p13), [#allocation6], 4294965248  ;;  %v2493_v0 = vmov 0   ;;  %v2229_v1 = vld [vmem:[#allocation5] sm:$0xff]   ;;  %v2230_v2 = vld [vmem:[#allocation5 + $0x8] sm:$0xff]   ;;  %s1707_s10 = sshll.u32 %s2668_s27, 8 }
  0x5c   : > { %758 = vmatprep.subr.bf16.mxu0 %v2493_v0  ;;  %2117 = vmatprep.subr.bf16.mxu1 %v2493_v0  ;;  %v2231_v3 = vld [vmem:[#allocation5 + $0x10] sm:$0xff]   ;;  %v2232_v4 = vld [vmem:[#allocation5 + $0x18] sm:$0xff]   ;;  %v2233_v5 = vld [vmem:[#allocation5 + $0x20] sm:$0xff]   ;;  %s2799_s11 = scalar_lea.vmem [#allocation7], %s1707_s10  ;;  %s1925_s18 = sshll.u32 %s2477_s15, 12 }
  0x5d   : > { %759 = vmatpush1.bf16.msra.mxu0 %v2229_v1  ;;  %2133 = vmatpush1.bf16.msra.mxu1 %v2229_v1  ;;  %v2247_v6 = vld [vmem:[%s2672_s6 + $0x4] ss:$8 sps:$4 sm:$0xff]   ;;  %v2235_v9 = vld [vmem:[#allocation5 + $0x30] sm:$0xff]   ;;  %v2236_v10 = vld [vmem:[#allocation5 + $0x38] sm:$0xff]   ;;  %s1584_s26 = sshll.u32 %s2799_s11, 4  ;;  %s2954_s21 = scalar_lea.hbm %s3009_s3, %s1925_s18  ;;  %s2956_s26 = int_to_ptr.vmem [resolvable:$true] %s1584_s26 }
  0x5e   : > { %760 = vmatprep.subr.bf16.mxu0 %v2493_v0  ;;  %2118 = vmatprep.subr.bf16.mxu1 %v2493_v0  ;;  %v2234_v7 = vld [vmem:[#allocation5 + $0x28] sm:$0xff]   ;;  %v2237_v11 = vld [vmem:[#allocation5 + $0x40] sm:$0xff]   ;;  %v2239_v13 = vld [vmem:[#allocation5 + $0x50] sm:$0xff]   ;;  %s1570_s15 = scalar_lea.sflag [#allocation4], %s2668_s27  ;;  %s2399_s19 = scalar_lea.vmem %s2956_s26, 4096 }
  0x5f   : > { %v2250_v8 = vld [vmem:[%s2672_s6 + $0x104] ss:$8 sps:$4 sm:$0xff]   ;;  %790 = vmatprep.mubr.bf16.mxu0 %v2247_v6  ;;  %v2240_v14 = vld [vmem:[#allocation5 + $0x58] sm:$0xff]   ;;  %v2243_v17 = vld [vmem:[#allocation5 + $0x70] sm:$0xff]   ;;  %p2400_p4 = scmp.ne.s32.totalorder %s2956_s26, %s2399_s19  ;;  %s2494_s25 = smov [#allocation7]  }
  0x60   : > { %918 = vmatprep.mubr.bf16.mxu1 %v2250_v8  ;;  %v2238_v12 = vld [vmem:[#allocation5 + $0x48] sm:$0xff]   ;;  %v2241_v15 = vld [vmem:[#allocation5 + $0x60] sm:$0xff]   ;;  %v2244_v18 = vld [vmem:[#allocation5 + $0x78] sm:$0xff]   ;;  %s2403_s29 = sshll.u32 %s2494_s25, 4  ;;  %s2404_s29 = int_to_ptr.vmem [resolvable:$false] %s2403_s29 }
  0x61   : > { %761 = vmatpush1.bf16.msra.mxu0 %v2230_v2  ;;  %2134 = vmatpush1.bf16.msra.mxu1 %v2230_v2  ;;  %v2242_v16 = vld [vmem:[#allocation5 + $0x68] sm:$0xff]   ;;  %v2251_v21 = vld [vmem:[%s2672_s6 + $0x14] ss:$8 sps:$4 sm:$0xff]   ;;  %v2255_v23 = vld [vmem:[%s2672_s6 + $0x10] ss:$8 sps:$4 sm:$0xff]   ;;  %p2401_p6 = pnand %p2400_p4, %p2612_p11  ;;  %s2405_s4 = scalar_lea.vmem %s2404_s29, 8192 }
  0x62   : > { %762 = vmatprep.subr.bf16.mxu0 %v2493_v0  ;;  %2119 = vmatprep.subr.bf16.mxu1 %v2493_v0  ;;  %v2245_v19 = vld [vmem:[%s2672_s6] ss:$8 sps:$4 sm:$0xff]   ;;  %v2253_v22 = vld [vmem:[%s2672_s6 + $0x114] ss:$8 sps:$4 sm:$0xff]   ;;  %v2256_v24 = vld [vmem:[%s2672_s6 + $0x110] ss:$8 sps:$4 sm:$0xff]   ;;  %p2406_p12 = scmp.lt.s32.totalorder %s2956_s26, %s2404_s29  ;;  %p2407_p10 = scmp.lt.s32.totalorder %s2405_s4, %s2399_s19 }
  0x63   : > { %v2248_v20 = vld [vmem:[%s2672_s6 + $0x100] ss:$8 sps:$4 sm:$0xff]   ;;  %v2257_v25 = vld [vmem:[%s2672_s6 + $0x24] ss:$8 sps:$4 sm:$0xff]   ;;  %v2263_v29 = vld [vmem:[%s2672_s6 + $0x34] ss:$8 sps:$4 sm:$0xff]   ;;  %p2402_p8 = pneg %p2401_p6 }
  0x64   : > { %v2259_v26 = vld [vmem:[%s2672_s6 + $0x124] ss:$8 sps:$4 sm:$0xff]   ;;  %v2261_v27 = vld [vmem:[%s2672_s6 + $0x20] ss:$8 sps:$4 sm:$0xff]   ;;  %v2265_v30 = vld [vmem:[%s2672_s6 + $0x134] ss:$8 sps:$4 sm:$0xff]   ;;  %p2408_p0 = por %p2407_p10, %p2406_p12 }
  0x65   : > { %763 = vmatpush1.bf16.msra.mxu0 %v2231_v3  ;;  %2135 = vmatpush1.bf16.msra.mxu1 %v2231_v3  ;;  %v2262_v28 = vld [vmem:[%s2672_s6 + $0x120] ss:$8 sps:$4 sm:$0xff]   ;;  %v2267_v31 = vld [vmem:[%s2672_s6 + $0x30] ss:$8 sps:$4 sm:$0xff]   ;;  %v2269_v33 = vld [vmem:[%s2672_s6 + $0x44] ss:$8 sps:$4 sm:$0xff]  }
  0x66   : > { %764 = vmatprep.subr.bf16.mxu0 %v2493_v0  ;;  %2120 = vmatprep.subr.bf16.mxu1 %v2493_v0  ;;  %v2268_v32 = vld [vmem:[%s2672_s6 + $0x130] ss:$8 sps:$4 sm:$0xff]   ;;  %v2271_v34 = vld [vmem:[%s2672_s6 + $0x144] ss:$8 sps:$4 sm:$0xff]   ;;  %v2273_v35 = vld [vmem:[%s2672_s6 + $0x40] ss:$8 sps:$4 sm:$0xff]   ;;  %p2409_p5 = pnand %p2408_p0, %p2402_p8 }
  0x67   : > { %v2274_v36 = vld [vmem:[%s2672_s6 + $0x140] ss:$8 sps:$4 sm:$0xff]   ;;  %v2275_v37 = vld [vmem:[%s2672_s6 + $0x54] ss:$8 sps:$4 sm:$0xff]   ;;  %v2279_v39 = vld [vmem:[%s2672_s6 + $0x50] ss:$8 sps:$4 sm:$0xff]  }
  0x68   : > { %v2277_v38 = vld [vmem:[%s2672_s6 + $0x154] ss:$8 sps:$4 sm:$0xff]   ;;  %v2280_v40 = vld [vmem:[%s2672_s6 + $0x150] ss:$8 sps:$4 sm:$0xff]   ;;  %v2281_v41 = vld [vmem:[%s2672_s6 + $0x64] ss:$8 sps:$4 sm:$0xff]  }
  0x69   : > { %765 = vmatpush1.bf16.msra.mxu0 %v2232_v4  ;;  %2136 = vmatpush1.bf16.msra.mxu1 %v2232_v4  ;;  %v2283_v42 = vld [vmem:[%s2672_s6 + $0x164] ss:$8 sps:$4 sm:$0xff]   ;;  %v2285_v43 = vld [vmem:[%s2672_s6 + $0x60] ss:$8 sps:$4 sm:$0xff]   ;;  %v2287_v45 = vld [vmem:[%s2672_s6 + $0x74] ss:$8 sps:$4 sm:$0xff]  }
  0x6a   : > { %766 = vmatprep.subr.bf16.mxu0 %v2493_v0  ;;  %2121 = vmatprep.subr.bf16.mxu1 %v2493_v0  ;;  %v2286_v44 = vld [vmem:[%s2672_s6 + $0x160] ss:$8 sps:$4 sm:$0xff]   ;;  %v2289_v46 = vld [vmem:[%s2672_s6 + $0x174] ss:$8 sps:$4 sm:$0xff]   ;;  %v2291_v47 = vld [vmem:[%s2672_s6 + $0x70] ss:$8 sps:$4 sm:$0xff]  }
  0x6b   : > { %v2292_v48 = vld [vmem:[%s2672_s6 + $0x170] ss:$8 sps:$4 sm:$0xff]   ;;  %v2293_v49 = vld [vmem:[%s2672_s6 + $0x84] ss:$8 sps:$4 sm:$0xff]   ;;  %v2297_v51 = vld [vmem:[%s2672_s6 + $0x80] ss:$8 sps:$4 sm:$0xff]  }
  0x6c   : > { %v2295_v50 = vld [vmem:[%s2672_s6 + $0x184] ss:$8 sps:$4 sm:$0xff]   ;;  %v2298_v52 = vld [vmem:[%s2672_s6 + $0x180] ss:$8 sps:$4 sm:$0xff]   ;;  %v2299_v53 = vld [vmem:[%s2672_s6 + $0x94] ss:$8 sps:$4 sm:$0xff]  }
  0x6d   : > { %767 = vmatpush1.bf16.msra.mxu0 %v2233_v5  ;;  %2137 = vmatpush1.bf16.msra.mxu1 %v2233_v5  ;;  %v2301_v54 = vld [vmem:[%s2672_s6 + $0x194] ss:$8 sps:$4 sm:$0xff]   ;;  %v2303_v55 = vld [vmem:[%s2672_s6 + $0x90] ss:$8 sps:$4 sm:$0xff]   ;;  %v2305_v57 = vld [vmem:[%s2672_s6 + $0xa4] ss:$8 sps:$4 sm:$0xff]  }
  0x6e   : > { %768 = vmatprep.subr.bf16.mxu0 %v2493_v0  ;;  %2122 = vmatprep.subr.bf16.mxu1 %v2493_v0  ;;  %v2304_v56 = vld [vmem:[%s2672_s6 + $0x190] ss:$8 sps:$4 sm:$0xff]   ;;  %v2307_v58 = vld [vmem:[%s2672_s6 + $0x1a4] ss:$8 sps:$4 sm:$0xff]   ;;  %v2309_v59 = vld [vmem:[%s2672_s6 + $0xa0] ss:$8 sps:$4 sm:$0xff]  }
  0x6f   : > { %v2310_v60 = vld [vmem:[%s2672_s6 + $0x1a0] ss:$8 sps:$4 sm:$0xff]   ;;  %v2311_v61 = vld [vmem:[%s2672_s6 + $0xb4] ss:$8 sps:$4 sm:$0xff]   ;;  %v2315_v63 = vld [vmem:[%s2672_s6 + $0xb0] ss:$8 sps:$4 sm:$0xff]  }
  0x70   : > { %v2313_v62 = vld [vmem:[%s2672_s6 + $0x1b4] ss:$8 sps:$4 sm:$0xff]   ;;  %v2317_v1 = vld [vmem:[%s2672_s6 + $0xc4] ss:$8 sps:$4 sm:$0xff]   ;;  %v2321_v3 = vld [vmem:[%s2672_s6 + $0xc0] ss:$8 sps:$4 sm:$0xff]  }
  0x71   : > { %769 = vmatpush1.bf16.msra.mxu0 %v2234_v7  ;;  %2138 = vmatpush1.bf16.msra.mxu1 %v2234_v7  ;;  %v2319_v2 = vld [vmem:[%s2672_s6 + $0x1c4] ss:$8 sps:$4 sm:$0xff]   ;;  %v2322_v4 = vld [vmem:[%s2672_s6 + $0x1c0] ss:$8 sps:$4 sm:$0xff]   ;;  %v2323_v5 = vld [vmem:[%s2672_s6 + $0xd4] ss:$8 sps:$4 sm:$0xff]  }
  0x72   : > { %770 = vmatprep.subr.bf16.mxu0 %v2493_v0  ;;  %2123 = vmatprep.subr.bf16.mxu1 %v2493_v0  ;;  %v2325_v6 = vld [vmem:[%s2672_s6 + $0x1d4] ss:$8 sps:$4 sm:$0xff]   ;;  %v2327_v7 = vld [vmem:[%s2672_s6 + $0xd0] ss:$8 sps:$4 sm:$0xff]  }
  0x73   : > { %v2328_v8 = vld [vmem:[%s2672_s6 + $0x1d0] ss:$8 sps:$4 sm:$0xff]  }
  0x75   : > { %771 = vmatpush1.bf16.msra.mxu0 %v2235_v9  ;;  %2139 = vmatpush1.bf16.msra.mxu1 %v2235_v9  ;;  %v2329_v9 = vld [vmem:[%s2672_s6 + $0xe4] ss:$8 sps:$4 sm:$0xff]  }
  0x76   : > { %772 = vmatprep.subr.bf16.mxu0 %v2493_v0  ;;  %2124 = vmatprep.subr.bf16.mxu1 %v2493_v0 }
  0x79   : > { %773 = vmatpush1.bf16.msra.mxu0 %v2236_v10  ;;  %2140 = vmatpush1.bf16.msra.mxu1 %v2236_v10  ;;  %v2331_v10 = vld [vmem:[%s2672_s6 + $0x1e4] ss:$8 sps:$4 sm:$0xff]  }
  0x7a   : > { %774 = vmatprep.subr.bf16.mxu0 %v2493_v0  ;;  %2125 = vmatprep.subr.bf16.mxu1 %v2493_v0 }
  0x7d   : > { %775 = vmatpush1.bf16.msra.mxu0 %v2237_v11  ;;  %2141 = vmatpush1.bf16.msra.mxu1 %v2237_v11  ;;  %v2333_v11 = vld [vmem:[%s2672_s6 + $0xe0] ss:$8 sps:$4 sm:$0xff]  }
  0x7e   : > { %776 = vmatprep.subr.bf16.mxu0 %v2493_v0  ;;  %2126 = vmatprep.subr.bf16.mxu1 %v2493_v0 }
  0x81   : > { %777 = vmatpush1.bf16.msra.mxu0 %v2238_v12  ;;  %2142 = vmatpush1.bf16.msra.mxu1 %v2238_v12  ;;  %v2334_v12 = vld [vmem:[%s2672_s6 + $0x1e0] ss:$8 sps:$4 sm:$0xff]  }
  0x82   : > { %778 = vmatprep.subr.bf16.mxu0 %v2493_v0  ;;  %2127 = vmatprep.subr.bf16.mxu1 %v2493_v0 }
  0x85   : > { %779 = vmatpush1.bf16.msra.mxu0 %v2239_v13  ;;  %2143 = vmatpush1.bf16.msra.mxu1 %v2239_v13  ;;  %v2335_v13 = vld [vmem:[%s2672_s6 + $0xf4] ss:$8 sps:$4 sm:$0xff]  }
  0x86   : > { %780 = vmatprep.subr.bf16.mxu0 %v2493_v0  ;;  %2128 = vmatprep.subr.bf16.mxu1 %v2493_v0 }
  0x89   : > { %781 = vmatpush1.bf16.msra.mxu0 %v2240_v14  ;;  %2144 = vmatpush1.bf16.msra.mxu1 %v2240_v14  ;;  %v2337_v14 = vld [vmem:[%s2672_s6 + $0x1f4] ss:$8 sps:$4 sm:$0xff]  }
  0x8a   : > { %782 = vmatprep.subr.bf16.mxu0 %v2493_v0  ;;  %2129 = vmatprep.subr.bf16.mxu1 %v2493_v0 }
  0x8d   : > { %783 = vmatpush1.bf16.msra.mxu0 %v2241_v15  ;;  %2145 = vmatpush1.bf16.msra.mxu1 %v2241_v15  ;;  %v2339_v15 = vld [vmem:[%s2672_s6 + $0xf0] ss:$8 sps:$4 sm:$0xff]  }
  0x8e   : > { %784 = vmatprep.subr.bf16.mxu0 %v2493_v0  ;;  %2130 = vmatprep.subr.bf16.mxu1 %v2493_v0 }
  0x91   : > { %785 = vmatpush1.bf16.msra.mxu0 %v2242_v16  ;;  %2146 = vmatpush1.bf16.msra.mxu1 %v2242_v16  ;;  %v2340_v16 = vld [vmem:[%s2672_s6 + $0x1f0] ss:$8 sps:$4 sm:$0xff]  }
  0x92   : > { %786 = vmatprep.subr.bf16.mxu0 %v2493_v0  ;;  %2131 = vmatprep.subr.bf16.mxu1 %v2493_v0 }
  0x95   : > { %787 = vmatpush1.bf16.msra.mxu0 %v2243_v17  ;;  %2147 = vmatpush1.bf16.msra.mxu1 %v2243_v17  ;;  %v2781_v17 = vld [vmem:[%s3008_s2] ss:$0 sm:$0xff] }
  0x96   : > { %788 = vmatprep.subr.bf16.mxu0 %v2493_v0  ;;  %2132 = vmatprep.subr.bf16.mxu1 %v2493_v0  ;;  %v2316_v0 = vld [vmem:[%s2672_s6 + $0x1b0] ss:$8 sps:$4 sm:$0xff]  }
  0x99   : > { %789 = vmatpush1.bf16.msra.mxu0 %v2244_v18  ;;  %2148 = vmatpush1.bf16.msra.mxu1 %v2244_v18 }
  0x9c   : > { %791 = vmatmul.mubr.bf16.vlgmr.msra.gmra.mrb[0].mxu0 %v2245_v19  ;;  %919 = vmatmul.mubr.bf16.vlgmr.msra.gmra.mrb[0].mxu1 %v2248_v20  ;;  %v2786_v19 = vld [vmem:[%s3008_s2 + $0x1] ss:$0 sm:$0xff] }
  0x9d   : > { %798 = vmatprep.mubr.bf16.mxu0 %v2251_v21  ;;  %926 = vmatprep.mubr.bf16.mxu1 %v2253_v22 }
  0xa4   : > { %799 = vmatmul.mubr.bf16.gmra.mrb[4].mxu0 %v2255_v23  ;;  %927 = vmatmul.mubr.bf16.gmra.mrb[4].mxu1 %v2256_v24 }
  0xa5   : > { %806 = vmatprep.mubr.bf16.mxu0 %v2257_v25  ;;  %934 = vmatprep.mubr.bf16.mxu1 %v2259_v26 }
  0xac   : > { %807 = vmatmul.mubr.bf16.gmra.mrb[8].mxu0 %v2261_v27  ;;  %935 = vmatmul.mubr.bf16.gmra.mrb[8].mxu1 %v2262_v28 }
  0xad   : > { %814 = vmatprep.mubr.bf16.mxu0 %v2263_v29  ;;  %942 = vmatprep.mubr.bf16.mxu1 %v2265_v30 }
  0xb4   : > { %815 = vmatmul.mubr.bf16.gmra.mrb[12].mxu0 %v2267_v31  ;;  %943 = vmatmul.mubr.bf16.gmra.mrb[12].mxu1 %v2268_v32 }
  0xb5   : > { %822 = vmatprep.mubr.bf16.mxu0 %v2269_v33  ;;  %950 = vmatprep.mubr.bf16.mxu1 %v2271_v34 }
  0xbc   : > { %823 = vmatmul.mubr.bf16.gmra.mrb[16].mxu0 %v2273_v35  ;;  %951 = vmatmul.mubr.bf16.gmra.mrb[16].mxu1 %v2274_v36 }
  0xbd   : > { %830 = vmatprep.mubr.bf16.mxu0 %v2275_v37  ;;  %958 = vmatprep.mubr.bf16.mxu1 %v2277_v38 }
  0xc4   : > { %831 = vmatmul.mubr.bf16.gmra.mrb[20].mxu0 %v2279_v39  ;;  %959 = vmatmul.mubr.bf16.gmra.mrb[20].mxu1 %v2280_v40 }
  0xc5   : > { %838 = vmatprep.mubr.bf16.mxu0 %v2281_v41  ;;  %966 = vmatprep.mubr.bf16.mxu1 %v2283_v42 }
  0xcc   : > { %839 = vmatmul.mubr.bf16.gmra.mrb[24].mxu0 %v2285_v43  ;;  %967 = vmatmul.mubr.bf16.gmra.mrb[24].mxu1 %v2286_v44 }
  0xcd   : > { %846 = vmatprep.mubr.bf16.mxu0 %v2287_v45  ;;  %974 = vmatprep.mubr.bf16.mxu1 %v2289_v46 }
  0xd4   : > { %847 = vmatmul.mubr.bf16.gmra.mrb[28].mxu0 %v2291_v47  ;;  %975 = vmatmul.mubr.bf16.gmra.mrb[28].mxu1 %v2292_v48 }
  0xd5   : > { %854 = vmatprep.mubr.bf16.mxu0 %v2293_v49  ;;  %982 = vmatprep.mubr.bf16.mxu1 %v2295_v50 }
  0xdc   : > { %855 = vmatmul.mubr.bf16.gmra.mrb[32].mxu0 %v2297_v51  ;;  %983 = vmatmul.mubr.bf16.gmra.mrb[32].mxu1 %v2298_v52 }
  0xdd   : > { %862 = vmatprep.mubr.bf16.mxu0 %v2299_v53  ;;  %990 = vmatprep.mubr.bf16.mxu1 %v2301_v54 }
  0xe4   : > { %863 = vmatmul.mubr.bf16.gmra.mrb[36].mxu0 %v2303_v55  ;;  %991 = vmatmul.mubr.bf16.gmra.mrb[36].mxu1 %v2304_v56 }
  0xe5   : > { %870 = vmatprep.mubr.bf16.mxu0 %v2305_v57  ;;  %998 = vmatprep.mubr.bf16.mxu1 %v2307_v58 }
  0xec   : > { %871 = vmatmul.mubr.bf16.gmra.mrb[40].mxu0 %v2309_v59  ;;  %999 = vmatmul.mubr.bf16.gmra.mrb[40].mxu1 %v2310_v60 }
  0xed   : > { %878 = vmatprep.mubr.bf16.mxu0 %v2311_v61  ;;  %1006 = vmatprep.mubr.bf16.mxu1 %v2313_v62 }
  0xf4   : > { %879 = vmatmul.mubr.bf16.gmra.mrb[44].mxu0 %v2315_v63  ;;  %1007 = vmatmul.mubr.bf16.gmra.mrb[44].mxu1 %v2316_v0 }
  0xf5   : > { %886 = vmatprep.mubr.bf16.mxu0 %v2317_v1  ;;  %1014 = vmatprep.mubr.bf16.mxu1 %v2319_v2 }
  0xfc   : > { %887 = vmatmul.mubr.bf16.gmra.mrb[48].mxu0 %v2321_v3  ;;  %1015 = vmatmul.mubr.bf16.gmra.mrb[48].mxu1 %v2322_v4 }
  0xfd   : > { %894 = vmatprep.mubr.bf16.mxu0 %v2323_v5  ;;  %1022 = vmatprep.mubr.bf16.mxu1 %v2325_v6 }
 0x104   : > { %895 = vmatmul.mubr.bf16.gmra.mrb[52].mxu0 %v2327_v7  ;;  %1023 = vmatmul.mubr.bf16.gmra.mrb[52].mxu1 %v2328_v8 }
 0x105   : > { %902 = vmatprep.mubr.bf16.mxu0 %v2329_v9  ;;  %1030 = vmatprep.mubr.bf16.mxu1 %v2331_v10 }
 0x10c   : > { %903 = vmatmul.mubr.bf16.gmra.mrb[56].mxu0 %v2333_v11  ;;  %1031 = vmatmul.mubr.bf16.gmra.mrb[56].mxu1 %v2334_v12 }
 0x10d   : > { %910 = vmatprep.mubr.bf16.mxu0 %v2335_v13  ;;  %1038 = vmatprep.mubr.bf16.mxu1 %v2337_v14 }
 0x114   : > { %911 = vmatmul.mubr.bf16.gmra.mrb[60].mxu0 %v2339_v15  ;;  %1039 = vmatmul.mubr.bf16.gmra.mrb[60].mxu1 %v2340_v16 }
 0x16f   : > { %v792_v18 = vpop.f32.mrb[0].mxu0  ;;  %v920_v20 = vpop.f32.mrb[0].mxu1 }
 0x170   : > { %v1052_v21 = vmul.f32 %v2781_v17, %v792_v18  ;;  %v1084_v22 = vmul.f32 %v2781_v17, %v920_v20  ;;  %v794_v23 = vpop.f32.mrb[1].mxu0  ;;  %v922_v24 = vpop.f32.mrb[1].mxu1 }
 0x171   : > { %v795_v25 = vpop.f32.mrb[2].mxu0  ;;  %v923_v26 = vpop.f32.mrb[2].mxu1 }
 0x172   : > { %v1121_v27 = vadd.f32 %v2786_v19, %v1052_v21  ;;  %v1153_v28 = vadd.f32 %v2786_v19, %v1084_v22  ;;  %v1053_v29 = vmul.f32 %v2781_v17, %v795_v25  ;;  %v1085_v30 = vmul.f32 %v2781_v17, %v923_v26  ;;  %v797_v31 = vpop.f32.mrb[3].mxu0  ;;  %v925_v32 = vpop.f32.mrb[3].mxu1 }
 0x174   : > { %v1122_v33 = vadd.f32 %v2786_v19, %v1053_v29  ;;  %v1154_v34 = vadd.f32 %v2786_v19, %v1085_v30  ;;  %v1185_v35 = vmax.f32 %v1121_v27, 0.0  ;;  %v1217_v36 = vmax.f32 %v1153_v28, 0.0 }
 0x176   : > { %v1186_v37 = vmax.f32 %v1122_v33, 0.0  ;;  %v1218_v38 = vmax.f32 %v1154_v34, 0.0 }
 0x177   : > { %v800_v39 = vpop.f32.mrb[4].mxu0  ;;  %v928_v40 = vpop.f32.mrb[4].mxu1 }
 0x178   : > { %v1929_v41 = vpack.c.bf16 %v1186_v37, %v1185_v35  ;;  %v2009_v42 = vpack.c.bf16 %v1218_v38, %v1217_v36  ;;  %v1054_v43 = vmul.f32 %v2781_v17, %v800_v39  ;;  %v1086_v44 = vmul.f32 %v2781_v17, %v928_v40  ;;  %v802_v45 = vpop.f32.mrb[5].mxu0  ;;  %v930_v46 = vpop.f32.mrb[5].mxu1 }
 0x179   : > { %v803_v47 = vpop.f32.mrb[6].mxu0  ;;  %v931_v48 = vpop.f32.mrb[6].mxu1 }
 0x17a   : > { %1930 = vst [vmem:[%s2799_s11] sm:$0xff] %v1929_v41   ;;  %2101 = vst [vmem:[%s2799_s11 + $0x80] sm:$0xff] %v2009_v42   ;;  %v1123_v49 = vadd.f32 %v2786_v19, %v1054_v43  ;;  %v1155_v50 = vadd.f32 %v2786_v19, %v1086_v44  ;;  %v1055_v51 = vmul.f32 %v2781_v17, %v803_v47  ;;  %v805_v53 = vpop.f32.mrb[7].mxu0  ;;  %v933_v54 = vpop.f32.mrb[7].mxu1 }
 0x17b   : > { %v1087_v52 = vmul.f32 %v2781_v17, %v931_v48 }
 0x17c   : > { %v1124_v55 = vadd.f32 %v2786_v19, %v1055_v51  ;;  %v1187_v57 = vmax.f32 %v1123_v49, 0.0  ;;  %v1219_v58 = vmax.f32 %v1155_v50, 0.0 }
 0x17d   : > { %v1156_v56 = vadd.f32 %v2786_v19, %v1087_v52 }
 0x17e   : > { %v1188_v59 = vmax.f32 %v1124_v55, 0.0 }
 0x17f   : > { %v1220_v60 = vmax.f32 %v1156_v56, 0.0  ;;  %v808_v61 = vpop.f32.mrb[8].mxu0  ;;  %v936_v62 = vpop.f32.mrb[8].mxu1 }
 0x180   : > { %v1934_v63 = vpack.c.bf16 %v1188_v59, %v1187_v57  ;;  %v1056_v1 = vmul.f32 %v2781_v17, %v808_v61  ;;  %v1088_v2 = vmul.f32 %v2781_v17, %v936_v62  ;;  %v810_v3 = vpop.f32.mrb[9].mxu0  ;;  %v938_v4 = vpop.f32.mrb[9].mxu1 }
 0x181   : > { %v2014_v0 = vpack.c.bf16 %v1220_v60, %v1219_v58  ;;  %v811_v5 = vpop.f32.mrb[10].mxu0  ;;  %v939_v6 = vpop.f32.mrb[10].mxu1 }
 0x182   : > { %2086 = vst [vmem:[%s2799_s11 + $0x8] sm:$0xff] %v1934_v63   ;;  %v1125_v7 = vadd.f32 %v2786_v19, %v1056_v1  ;;  %v1157_v8 = vadd.f32 %v2786_v19, %v1088_v2  ;;  %v1057_v9 = vmul.f32 %v2781_v17, %v811_v5  ;;  %v1089_v10 = vmul.f32 %v2781_v17, %v939_v6  ;;  %v813_v11 = vpop.f32.mrb[11].mxu0  ;;  %v941_v12 = vpop.f32.mrb[11].mxu1 }
 0x183   : > { %2102 = vst [vmem:[%s2799_s11 + $0x88] sm:$0xff] %v2014_v0  }
 0x184   : > { %v1126_v13 = vadd.f32 %v2786_v19, %v1057_v9  ;;  %v1158_v14 = vadd.f32 %v2786_v19, %v1089_v10  ;;  %v1189_v15 = vmax.f32 %v1125_v7, 0.0  ;;  %v1221_v16 = vmax.f32 %v1157_v8, 0.0 }
 0x186   : > { %v1190_v18 = vmax.f32 %v1126_v13, 0.0  ;;  %v1222_v20 = vmax.f32 %v1158_v14, 0.0 }
 0x187   : > { %v816_v21 = vpop.f32.mrb[12].mxu0  ;;  %v944_v22 = vpop.f32.mrb[12].mxu1 }
 0x188   : > { %v1939_v23 = vpack.c.bf16 %v1190_v18, %v1189_v15  ;;  %v2019_v24 = vpack.c.bf16 %v1222_v20, %v1221_v16  ;;  %v1058_v25 = vmul.f32 %v2781_v17, %v816_v21  ;;  %v1090_v26 = vmul.f32 %v2781_v17, %v944_v22  ;;  %v818_v27 = vpop.f32.mrb[13].mxu0  ;;  %v946_v28 = vpop.f32.mrb[13].mxu1 }
 0x189   : > { %v819_v29 = vpop.f32.mrb[14].mxu0  ;;  %v947_v30 = vpop.f32.mrb[14].mxu1 }
 0x18a   : > { %2087 = vst [vmem:[%s2799_s11 + $0x10] sm:$0xff] %v1939_v23   ;;  %2103 = vst [vmem:[%s2799_s11 + $0x90] sm:$0xff] %v2019_v24   ;;  %v1127_v31 = vadd.f32 %v2786_v19, %v1058_v25  ;;  %v1159_v32 = vadd.f32 %v2786_v19, %v1090_v26  ;;  %v1059_v33 = vmul.f32 %v2781_v17, %v819_v29  ;;  %v821_v35 = vpop.f32.mrb[15].mxu0  ;;  %v949_v36 = vpop.f32.mrb[15].mxu1 }
 0x18b   : > { %v1091_v34 = vmul.f32 %v2781_v17, %v947_v30 }
 0x18c   : > { %v1128_v37 = vadd.f32 %v2786_v19, %v1059_v33  ;;  %v1191_v39 = vmax.f32 %v1127_v31, 0.0  ;;  %v1223_v40 = vmax.f32 %v1159_v32, 0.0 }
 0x18d   : > { %v1160_v38 = vadd.f32 %v2786_v19, %v1091_v34 }
 0x18e   : > { %v1192_v41 = vmax.f32 %v1128_v37, 0.0 }
 0x18f   : > { %v1224_v42 = vmax.f32 %v1160_v38, 0.0  ;;  %v824_v43 = vpop.f32.mrb[16].mxu0  ;;  %v952_v44 = vpop.f32.mrb[16].mxu1 }
 0x190   : > { %v1944_v45 = vpack.c.bf16 %v1192_v41, %v1191_v39  ;;  %v1060_v47 = vmul.f32 %v2781_v17, %v824_v43  ;;  %v1092_v48 = vmul.f32 %v2781_v17, %v952_v44  ;;  %v826_v49 = vpop.f32.mrb[17].mxu0  ;;  %v954_v50 = vpop.f32.mrb[17].mxu1 }
 0x191   : > { %v2024_v46 = vpack.c.bf16 %v1224_v42, %v1223_v40  ;;  %v827_v51 = vpop.f32.mrb[18].mxu0  ;;  %v955_v52 = vpop.f32.mrb[18].mxu1 }
 0x192   : > { %2088 = vst [vmem:[%s2799_s11 + $0x18] sm:$0xff] %v1944_v45   ;;  %v1129_v53 = vadd.f32 %v2786_v19, %v1060_v47  ;;  %v1161_v54 = vadd.f32 %v2786_v19, %v1092_v48  ;;  %v1061_v55 = vmul.f32 %v2781_v17, %v827_v51  ;;  %v1093_v56 = vmul.f32 %v2781_v17, %v955_v52  ;;  %v829_v57 = vpop.f32.mrb[19].mxu0  ;;  %v957_v58 = vpop.f32.mrb[19].mxu1 }
 0x193   : > { %2104 = vst [vmem:[%s2799_s11 + $0x98] sm:$0xff] %v2024_v46  }
 0x194   : > { %v1130_v59 = vadd.f32 %v2786_v19, %v1061_v55  ;;  %v1162_v60 = vadd.f32 %v2786_v19, %v1093_v56  ;;  %v1193_v61 = vmax.f32 %v1129_v53, 0.0  ;;  %v1225_v62 = vmax.f32 %v1161_v54, 0.0 }
 0x196   : > { %v1194_v63 = vmax.f32 %v1130_v59, 0.0  ;;  %v1226_v0 = vmax.f32 %v1162_v60, 0.0 }
 0x197   : > { %v832_v1 = vpop.f32.mrb[20].mxu0  ;;  %v960_v2 = vpop.f32.mrb[20].mxu1 }
 0x198   : > { %v1949_v3 = vpack.c.bf16 %v1194_v63, %v1193_v61  ;;  %v2029_v4 = vpack.c.bf16 %v1226_v0, %v1225_v62  ;;  %v1062_v5 = vmul.f32 %v2781_v17, %v832_v1  ;;  %v1094_v6 = vmul.f32 %v2781_v17, %v960_v2  ;;  %v834_v7 = vpop.f32.mrb[21].mxu0  ;;  %v962_v8 = vpop.f32.mrb[21].mxu1 }
 0x199   : > { %v835_v9 = vpop.f32.mrb[22].mxu0  ;;  %v963_v10 = vpop.f32.mrb[22].mxu1 }
 0x19a   : > { %2089 = vst [vmem:[%s2799_s11 + $0x20] sm:$0xff] %v1949_v3   ;;  %2105 = vst [vmem:[%s2799_s11 + $0xa0] sm:$0xff] %v2029_v4   ;;  %v1131_v11 = vadd.f32 %v2786_v19, %v1062_v5  ;;  %v1163_v12 = vadd.f32 %v2786_v19, %v1094_v6  ;;  %v1063_v13 = vmul.f32 %v2781_v17, %v835_v9  ;;  %v837_v15 = vpop.f32.mrb[23].mxu0  ;;  %v965_v16 = vpop.f32.mrb[23].mxu1 }
 0x19b   : > { %v1095_v14 = vmul.f32 %v2781_v17, %v963_v10 }
 0x19c   : > { %v1132_v18 = vadd.f32 %v2786_v19, %v1063_v13  ;;  %v1195_v21 = vmax.f32 %v1131_v11, 0.0  ;;  %v1227_v22 = vmax.f32 %v1163_v12, 0.0 }
 0x19d   : > { %v1164_v20 = vadd.f32 %v2786_v19, %v1095_v14 }
 0x19e   : > { %v1196_v23 = vmax.f32 %v1132_v18, 0.0 }
 0x19f   : > { %v1228_v24 = vmax.f32 %v1164_v20, 0.0  ;;  %v840_v25 = vpop.f32.mrb[24].mxu0  ;;  %v968_v26 = vpop.f32.mrb[24].mxu1 }
 0x1a0   : > { %v1954_v27 = vpack.c.bf16 %v1196_v23, %v1195_v21  ;;  %v1064_v29 = vmul.f32 %v2781_v17, %v840_v25  ;;  %v1096_v30 = vmul.f32 %v2781_v17, %v968_v26  ;;  %v842_v31 = vpop.f32.mrb[25].mxu0  ;;  %v970_v32 = vpop.f32.mrb[25].mxu1 }
 0x1a1   : > { %v2034_v28 = vpack.c.bf16 %v1228_v24, %v1227_v22  ;;  %v843_v33 = vpop.f32.mrb[26].mxu0  ;;  %v971_v34 = vpop.f32.mrb[26].mxu1 }
 0x1a2   : > { %2090 = vst [vmem:[%s2799_s11 + $0x28] sm:$0xff] %v1954_v27   ;;  %v1133_v35 = vadd.f32 %v2786_v19, %v1064_v29  ;;  %v1165_v36 = vadd.f32 %v2786_v19, %v1096_v30  ;;  %v1065_v37 = vmul.f32 %v2781_v17, %v843_v33  ;;  %v1097_v38 = vmul.f32 %v2781_v17, %v971_v34  ;;  %v845_v39 = vpop.f32.mrb[27].mxu0  ;;  %v973_v40 = vpop.f32.mrb[27].mxu1 }
 0x1a3   : > { %2106 = vst [vmem:[%s2799_s11 + $0xa8] sm:$0xff] %v2034_v28  }
 0x1a4   : > { %v1134_v41 = vadd.f32 %v2786_v19, %v1065_v37  ;;  %v1166_v42 = vadd.f32 %v2786_v19, %v1097_v38  ;;  %v1197_v43 = vmax.f32 %v1133_v35, 0.0  ;;  %v1229_v44 = vmax.f32 %v1165_v36, 0.0 }
 0x1a6   : > { %v1198_v45 = vmax.f32 %v1134_v41, 0.0  ;;  %v1230_v46 = vmax.f32 %v1166_v42, 0.0 }
 0x1a7   : > { %v848_v47 = vpop.f32.mrb[28].mxu0  ;;  %v976_v48 = vpop.f32.mrb[28].mxu1 }
 0x1a8   : > { %v1959_v49 = vpack.c.bf16 %v1198_v45, %v1197_v43  ;;  %v2039_v50 = vpack.c.bf16 %v1230_v46, %v1229_v44  ;;  %v1066_v51 = vmul.f32 %v2781_v17, %v848_v47  ;;  %v1098_v52 = vmul.f32 %v2781_v17, %v976_v48  ;;  %v850_v53 = vpop.f32.mrb[29].mxu0  ;;  %v978_v54 = vpop.f32.mrb[29].mxu1 }
 0x1a9   : > { %v851_v55 = vpop.f32.mrb[30].mxu0  ;;  %v979_v56 = vpop.f32.mrb[30].mxu1 }
 0x1aa   : > { %2091 = vst [vmem:[%s2799_s11 + $0x30] sm:$0xff] %v1959_v49   ;;  %2107 = vst [vmem:[%s2799_s11 + $0xb0] sm:$0xff] %v2039_v50   ;;  %v1135_v57 = vadd.f32 %v2786_v19, %v1066_v51  ;;  %v1167_v58 = vadd.f32 %v2786_v19, %v1098_v52  ;;  %v1067_v59 = vmul.f32 %v2781_v17, %v851_v55  ;;  %v853_v61 = vpop.f32.mrb[31].mxu0  ;;  %v981_v62 = vpop.f32.mrb[31].mxu1 }
 0x1ab   : > { %v1099_v60 = vmul.f32 %v2781_v17, %v979_v56 }
 0x1ac   : > { %v1136_v63 = vadd.f32 %v2786_v19, %v1067_v59  ;;  %v1199_v1 = vmax.f32 %v1135_v57, 0.0  ;;  %v1231_v2 = vmax.f32 %v1167_v58, 0.0 }
 0x1ad   : > { %v1168_v0 = vadd.f32 %v2786_v19, %v1099_v60 }
 0x1ae   : > { %v1200_v3 = vmax.f32 %v1136_v63, 0.0 }
 0x1af   : > { %v1232_v4 = vmax.f32 %v1168_v0, 0.0  ;;  %v856_v5 = vpop.f32.mrb[32].mxu0  ;;  %v984_v6 = vpop.f32.mrb[32].mxu1 }
 0x1b0   : > { %v1964_v7 = vpack.c.bf16 %v1200_v3, %v1199_v1  ;;  %v1068_v9 = vmul.f32 %v2781_v17, %v856_v5  ;;  %v1100_v10 = vmul.f32 %v2781_v17, %v984_v6  ;;  %v858_v11 = vpop.f32.mrb[33].mxu0  ;;  %v986_v12 = vpop.f32.mrb[33].mxu1 }
 0x1b1   : > { %v2044_v8 = vpack.c.bf16 %v1232_v4, %v1231_v2  ;;  %v859_v13 = vpop.f32.mrb[34].mxu0  ;;  %v987_v14 = vpop.f32.mrb[34].mxu1 }
 0x1b2   : > { %2092 = vst [vmem:[%s2799_s11 + $0x38] sm:$0xff] %v1964_v7   ;;  %v1137_v15 = vadd.f32 %v2786_v19, %v1068_v9  ;;  %v1169_v16 = vadd.f32 %v2786_v19, %v1100_v10  ;;  %v1069_v18 = vmul.f32 %v2781_v17, %v859_v13  ;;  %v1101_v20 = vmul.f32 %v2781_v17, %v987_v14  ;;  %v861_v21 = vpop.f32.mrb[35].mxu0  ;;  %v989_v22 = vpop.f32.mrb[35].mxu1 }
 0x1b3   : > { %2108 = vst [vmem:[%s2799_s11 + $0xb8] sm:$0xff] %v2044_v8  }
 0x1b4   : > { %v1138_v23 = vadd.f32 %v2786_v19, %v1069_v18  ;;  %v1170_v24 = vadd.f32 %v2786_v19, %v1101_v20  ;;  %v1201_v25 = vmax.f32 %v1137_v15, 0.0  ;;  %v1233_v26 = vmax.f32 %v1169_v16, 0.0 }
 0x1b6   : > { %v1202_v27 = vmax.f32 %v1138_v23, 0.0  ;;  %v1234_v28 = vmax.f32 %v1170_v24, 0.0 }
 0x1b7   : > { %v864_v29 = vpop.f32.mrb[36].mxu0  ;;  %v992_v30 = vpop.f32.mrb[36].mxu1 }
 0x1b8   : > { %v1969_v31 = vpack.c.bf16 %v1202_v27, %v1201_v25  ;;  %v2049_v32 = vpack.c.bf16 %v1234_v28, %v1233_v26  ;;  %v1070_v33 = vmul.f32 %v2781_v17, %v864_v29  ;;  %v1102_v34 = vmul.f32 %v2781_v17, %v992_v30  ;;  %v866_v35 = vpop.f32.mrb[37].mxu0  ;;  %v994_v36 = vpop.f32.mrb[37].mxu1 }
 0x1b9   : > { %v867_v37 = vpop.f32.mrb[38].mxu0  ;;  %v995_v38 = vpop.f32.mrb[38].mxu1 }
 0x1ba   : > { %2093 = vst [vmem:[%s2799_s11 + $0x40] sm:$0xff] %v1969_v31   ;;  %2109 = vst [vmem:[%s2799_s11 + $0xc0] sm:$0xff] %v2049_v32   ;;  %v1139_v39 = vadd.f32 %v2786_v19, %v1070_v33  ;;  %v1171_v40 = vadd.f32 %v2786_v19, %v1102_v34  ;;  %v1071_v41 = vmul.f32 %v2781_v17, %v867_v37  ;;  %v869_v43 = vpop.f32.mrb[39].mxu0  ;;  %v997_v44 = vpop.f32.mrb[39].mxu1 }
 0x1bb   : > { %v1103_v42 = vmul.f32 %v2781_v17, %v995_v38 }
 0x1bc   : > { %v1140_v45 = vadd.f32 %v2786_v19, %v1071_v41  ;;  %v1203_v47 = vmax.f32 %v1139_v39, 0.0  ;;  %v1235_v48 = vmax.f32 %v1171_v40, 0.0 }
 0x1bd   : > { %v1172_v46 = vadd.f32 %v2786_v19, %v1103_v42 }
 0x1be   : > { %v1204_v49 = vmax.f32 %v1140_v45, 0.0 }
 0x1bf   : > { %v1236_v50 = vmax.f32 %v1172_v46, 0.0  ;;  %v872_v51 = vpop.f32.mrb[40].mxu0  ;;  %v1000_v52 = vpop.f32.mrb[40].mxu1 }
 0x1c0   : > { %v1974_v53 = vpack.c.bf16 %v1204_v49, %v1203_v47  ;;  %v1072_v55 = vmul.f32 %v2781_v17, %v872_v51  ;;  %v1104_v56 = vmul.f32 %v2781_v17, %v1000_v52  ;;  %v874_v57 = vpop.f32.mrb[41].mxu0  ;;  %v1002_v58 = vpop.f32.mrb[41].mxu1 }
 0x1c1   : > { %v2054_v54 = vpack.c.bf16 %v1236_v50, %v1235_v48  ;;  %v875_v59 = vpop.f32.mrb[42].mxu0  ;;  %v1003_v60 = vpop.f32.mrb[42].mxu1 }
 0x1c2   : > { %2094 = vst [vmem:[%s2799_s11 + $0x48] sm:$0xff] %v1974_v53   ;;  %v1141_v61 = vadd.f32 %v2786_v19, %v1072_v55  ;;  %v1173_v62 = vadd.f32 %v2786_v19, %v1104_v56  ;;  %v1073_v63 = vmul.f32 %v2781_v17, %v875_v59  ;;  %v1105_v0 = vmul.f32 %v2781_v17, %v1003_v60  ;;  %v877_v1 = vpop.f32.mrb[43].mxu0  ;;  %v1005_v2 = vpop.f32.mrb[43].mxu1 }
 0x1c3   : > { %2110 = vst [vmem:[%s2799_s11 + $0xc8] sm:$0xff] %v2054_v54  }
 0x1c4   : > { %v1142_v3 = vadd.f32 %v2786_v19, %v1073_v63  ;;  %v1174_v4 = vadd.f32 %v2786_v19, %v1105_v0  ;;  %v1205_v5 = vmax.f32 %v1141_v61, 0.0  ;;  %v1237_v6 = vmax.f32 %v1173_v62, 0.0 }
 0x1c6   : > { %v1206_v7 = vmax.f32 %v1142_v3, 0.0  ;;  %v1238_v8 = vmax.f32 %v1174_v4, 0.0 }
 0x1c7   : > { %v880_v9 = vpop.f32.mrb[44].mxu0  ;;  %v1008_v10 = vpop.f32.mrb[44].mxu1 }
 0x1c8   : > { %v1979_v11 = vpack.c.bf16 %v1206_v7, %v1205_v5  ;;  %v2059_v12 = vpack.c.bf16 %v1238_v8, %v1237_v6  ;;  %v1074_v13 = vmul.f32 %v2781_v17, %v880_v9  ;;  %v1106_v14 = vmul.f32 %v2781_v17, %v1008_v10  ;;  %v882_v15 = vpop.f32.mrb[45].mxu0  ;;  %v1010_v16 = vpop.f32.mrb[45].mxu1 }
 0x1c9   : > { %v883_v18 = vpop.f32.mrb[46].mxu0  ;;  %v1011_v20 = vpop.f32.mrb[46].mxu1 }
 0x1ca   : > { %2095 = vst [vmem:[%s2799_s11 + $0x50] sm:$0xff] %v1979_v11   ;;  %2111 = vst [vmem:[%s2799_s11 + $0xd0] sm:$0xff] %v2059_v12   ;;  %v1143_v21 = vadd.f32 %v2786_v19, %v1074_v13  ;;  %v1175_v22 = vadd.f32 %v2786_v19, %v1106_v14  ;;  %v1075_v23 = vmul.f32 %v2781_v17, %v883_v18  ;;  %v885_v25 = vpop.f32.mrb[47].mxu0  ;;  %v1013_v26 = vpop.f32.mrb[47].mxu1 }
 0x1cb   : > { %v1107_v24 = vmul.f32 %v2781_v17, %v1011_v20 }
 0x1cc   : > { %v1144_v27 = vadd.f32 %v2786_v19, %v1075_v23  ;;  %v1207_v29 = vmax.f32 %v1143_v21, 0.0  ;;  %v1239_v30 = vmax.f32 %v1175_v22, 0.0 }
 0x1cd   : > { %v1176_v28 = vadd.f32 %v2786_v19, %v1107_v24 }
 0x1ce   : > { %v1208_v31 = vmax.f32 %v1144_v27, 0.0 }
 0x1cf   : > { %v1240_v32 = vmax.f32 %v1176_v28, 0.0  ;;  %v888_v33 = vpop.f32.mrb[48].mxu0  ;;  %v1016_v34 = vpop.f32.mrb[48].mxu1 }
 0x1d0   : > { %v1984_v35 = vpack.c.bf16 %v1208_v31, %v1207_v29  ;;  %v1076_v37 = vmul.f32 %v2781_v17, %v888_v33  ;;  %v1108_v38 = vmul.f32 %v2781_v17, %v1016_v34  ;;  %v890_v39 = vpop.f32.mrb[49].mxu0  ;;  %v1018_v40 = vpop.f32.mrb[49].mxu1 }
 0x1d1   : > { %v2064_v36 = vpack.c.bf16 %v1240_v32, %v1239_v30  ;;  %v891_v41 = vpop.f32.mrb[50].mxu0  ;;  %v1019_v42 = vpop.f32.mrb[50].mxu1 }
 0x1d2   : > { %2096 = vst [vmem:[%s2799_s11 + $0x58] sm:$0xff] %v1984_v35   ;;  %v1145_v43 = vadd.f32 %v2786_v19, %v1076_v37  ;;  %v1177_v44 = vadd.f32 %v2786_v19, %v1108_v38  ;;  %v1077_v45 = vmul.f32 %v2781_v17, %v891_v41  ;;  %v1109_v46 = vmul.f32 %v2781_v17, %v1019_v42  ;;  %v893_v47 = vpop.f32.mrb[51].mxu0  ;;  %v1021_v48 = vpop.f32.mrb[51].mxu1 }
 0x1d3   : > { %2112 = vst [vmem:[%s2799_s11 + $0xd8] sm:$0xff] %v2064_v36  }
 0x1d4   : > { %v1146_v49 = vadd.f32 %v2786_v19, %v1077_v45  ;;  %v1178_v50 = vadd.f32 %v2786_v19, %v1109_v46  ;;  %v1209_v51 = vmax.f32 %v1145_v43, 0.0  ;;  %v1241_v52 = vmax.f32 %v1177_v44, 0.0 }
 0x1d6   : > { %v1210_v53 = vmax.f32 %v1146_v49, 0.0  ;;  %v1242_v54 = vmax.f32 %v1178_v50, 0.0 }
 0x1d7   : > { %v896_v55 = vpop.f32.mrb[52].mxu0  ;;  %v1024_v56 = vpop.f32.mrb[52].mxu1 }
 0x1d8   : > { %v1989_v57 = vpack.c.bf16 %v1210_v53, %v1209_v51  ;;  %v2069_v58 = vpack.c.bf16 %v1242_v54, %v1241_v52  ;;  %v1078_v59 = vmul.f32 %v2781_v17, %v896_v55  ;;  %v1110_v60 = vmul.f32 %v2781_v17, %v1024_v56  ;;  %v898_v61 = vpop.f32.mrb[53].mxu0  ;;  %v1026_v62 = vpop.f32.mrb[53].mxu1 }
 0x1d9   : > { %v899_v63 = vpop.f32.mrb[54].mxu0  ;;  %v1027_v0 = vpop.f32.mrb[54].mxu1 }
 0x1da   : > { %2097 = vst [vmem:[%s2799_s11 + $0x60] sm:$0xff] %v1989_v57   ;;  %2113 = vst [vmem:[%s2799_s11 + $0xe0] sm:$0xff] %v2069_v58   ;;  %v1147_v1 = vadd.f32 %v2786_v19, %v1078_v59  ;;  %v1179_v2 = vadd.f32 %v2786_v19, %v1110_v60  ;;  %v1079_v3 = vmul.f32 %v2781_v17, %v899_v63  ;;  %v901_v5 = vpop.f32.mrb[55].mxu0  ;;  %v1029_v6 = vpop.f32.mrb[55].mxu1 }
 0x1db   : > { %v1111_v4 = vmul.f32 %v2781_v17, %v1027_v0 }
 0x1dc   : > { %v1148_v7 = vadd.f32 %v2786_v19, %v1079_v3  ;;  %v1211_v9 = vmax.f32 %v1147_v1, 0.0  ;;  %v1243_v10 = vmax.f32 %v1179_v2, 0.0 }
 0x1dd   : > { %v1180_v8 = vadd.f32 %v2786_v19, %v1111_v4 }
 0x1de   : > { %v1212_v11 = vmax.f32 %v1148_v7, 0.0 }
 0x1df   : > { %v1244_v12 = vmax.f32 %v1180_v8, 0.0  ;;  %v904_v13 = vpop.f32.mrb[56].mxu0  ;;  %v1032_v14 = vpop.f32.mrb[56].mxu1 }
 0x1e0   : > { %v1994_v15 = vpack.c.bf16 %v1212_v11, %v1211_v9  ;;  %v1080_v18 = vmul.f32 %v2781_v17, %v904_v13  ;;  %v1112_v20 = vmul.f32 %v2781_v17, %v1032_v14  ;;  %v906_v21 = vpop.f32.mrb[57].mxu0  ;;  %v1034_v22 = vpop.f32.mrb[57].mxu1 }
 0x1e1   : > { %v2074_v16 = vpack.c.bf16 %v1244_v12, %v1243_v10  ;;  %v907_v23 = vpop.f32.mrb[58].mxu0  ;;  %v1035_v24 = vpop.f32.mrb[58].mxu1 }
 0x1e2   : > { %2098 = vst [vmem:[%s2799_s11 + $0x68] sm:$0xff] %v1994_v15   ;;  %v1149_v25 = vadd.f32 %v2786_v19, %v1080_v18  ;;  %v1181_v26 = vadd.f32 %v2786_v19, %v1112_v20  ;;  %v1081_v27 = vmul.f32 %v2781_v17, %v907_v23  ;;  %v1113_v28 = vmul.f32 %v2781_v17, %v1035_v24  ;;  %v909_v29 = vpop.f32.mrb[59].mxu0  ;;  %v1037_v30 = vpop.f32.mrb[59].mxu1 }
 0x1e3   : > { %2114 = vst [vmem:[%s2799_s11 + $0xe8] sm:$0xff] %v2074_v16  }
 0x1e4   : > { %v1150_v31 = vadd.f32 %v2786_v19, %v1081_v27  ;;  %v1182_v32 = vadd.f32 %v2786_v19, %v1113_v28  ;;  %v1213_v33 = vmax.f32 %v1149_v25, 0.0  ;;  %v1245_v34 = vmax.f32 %v1181_v26, 0.0 }
 0x1e6   : > { %v1214_v35 = vmax.f32 %v1150_v31, 0.0  ;;  %v1246_v36 = vmax.f32 %v1182_v32, 0.0 }
 0x1e7   : > { %v912_v37 = vpop.f32.mrb[60].mxu0  ;;  %v1040_v38 = vpop.f32.mrb[60].mxu1 }
 0x1e8   : > { %v1999_v39 = vpack.c.bf16 %v1214_v35, %v1213_v33  ;;  %v2079_v40 = vpack.c.bf16 %v1246_v36, %v1245_v34  ;;  %v1082_v41 = vmul.f32 %v2781_v17, %v912_v37  ;;  %v1114_v42 = vmul.f32 %v2781_v17, %v1040_v38  ;;  %v914_v43 = vpop.f32.mrb[61].mxu0  ;;  %v1042_v44 = vpop.f32.mrb[61].mxu1 }
 0x1e9   : > { %v915_v45 = vpop.f32.mrb[62].mxu0  ;;  %v1043_v46 = vpop.f32.mrb[62].mxu1 }
 0x1ea   : > { %2099 = vst [vmem:[%s2799_s11 + $0x70] sm:$0xff] %v1999_v39   ;;  %2115 = vst [vmem:[%s2799_s11 + $0xf0] sm:$0xff] %v2079_v40   ;;  %v1151_v47 = vadd.f32 %v2786_v19, %v1082_v41  ;;  %v1183_v48 = vadd.f32 %v2786_v19, %v1114_v42  ;;  %v1083_v49 = vmul.f32 %v2781_v17, %v915_v45  ;;  %v917_v51 = vpop.f32.mrb[63].mxu0  ;;  %v1045_v52 = vpop.f32.mrb[63].mxu1 }
 0x1eb   : > { %v1115_v50 = vmul.f32 %v2781_v17, %v1043_v46 }
 0x1ec   : > { %v1152_v53 = vadd.f32 %v2786_v19, %v1083_v49  ;;  %v1215_v55 = vmax.f32 %v1151_v47, 0.0  ;;  %v1247_v56 = vmax.f32 %v1183_v48, 0.0 }
 0x1ed   : > { %v1184_v54 = vadd.f32 %v2786_v19, %v1115_v50 }
 0x1ee   : > { %v1216_v57 = vmax.f32 %v1152_v53, 0.0 }
 0x1ef   : > { %v1248_v58 = vmax.f32 %v1184_v54, 0.0 }
 0x1f0   : > { %v2004_v17 = vpack.c.bf16 %v1216_v57, %v1215_v55 }
 0x1f1   : > { %v2084_v59 = vpack.c.bf16 %v1248_v58, %v1247_v56 }
 0x1f2   : > { %2100 = vst [vmem:[%s2799_s11 + $0x78] sm:$0xff] %v2004_v17  }
 0x1f3   : > { %2116 = vst [vmem:[%s2799_s11 + $0xf8] sm:$0xff] %v2084_v59  }
 0x1f4   : > { %2412 = shalt.err (!%p2409_p5)
}
 0x1f5   : > { %s2413_s6 = scalar_lea.hbm %s2954_s21, 4096  ;;  %s2417_s24 = scalar_lea.hbm %s3009_s3, 16384 }
 0x1f6   : > { %p2414_p9 = scmp.ne.s32.totalorder %s2954_s21, %s2413_s6  ;;  %p2418_p3 = scmp.lt.u32.totalorder %s2954_s21, %s3009_s3 }
 0x1f7   : > { %p2419_p7 = scmp.lt.u32.totalorder %s2417_s24, %s2413_s6  ;;  %p2421_p4 = scmp.lt.u32.totalorder %s2413_s6, %s2954_s21 }
 0x1f8   : > { %p2415_p1 = pnand %p2414_p9, %p2612_p11 }
 0x1f9   : > { %p2420_p13 = por %p2419_p7, %p2418_p3 }
 0x1fa   : > { %p2416_p2 = pneg %p2415_p1 }
 0x1fb   : > { %p2422_p6 = por %p2421_p4, %p2420_p13 }
 0x1fd   : > { %p2423_p8 = pnand %p2422_p6, %p2416_p2 }
 0x1ff   : > { %2426 = shalt.err (!%p2423_p8)
}
 0x200   : > { %s2495_s11 = smov 64   ;;  %s2496_s18 = smov 4  }
 0x201   : > { %2155 = dma.vmem_to_hbm [thread:$0]  (%p2612_p11), %s2956_s26, 4096, %s2954_s21, %s1570_s15, %s2495_s11, %s2495_s11, %s2496_s18  }
 0x202 PF: > { %p2172_p12 = scmp.ge.s32.totalorder %s2485_s17, 2  ;;  %s1599_s7 = sand.u32 1, %s2465_s12  }
 0x203   : > { %p3027_p10 = scmp.ne.s32.totalorder %s3017_s23, 0  ;;  %s1600_s8 = scalar_lea.sflag [#allocation4], %s1599_s7 }
 0x205   : > { %p2166_p0 = pnand %p2172_p12, %p3027_p10 }
 0x207   : > { %2460 = dma.done.wait (!%p2166_p0), %s1600_s8, 4096  }
 0x208   : > { %2462 = vsyncadd (!%p2166_p0), %s1600_s8, 4294963200  ;;  %s20_s17 = sadd.s32 1, %s2485_s17   ;;  %s3028_s12 = smov %s2469_s13 }
 0x209   : > { %p17_p5 = scmp.ge.s32.totalorder %s20_s17, 6   ;;  %s3029_s13 = smov %s2473_s14 }
 0x20a   : > { %s3030_s14 = smov %s2621_s5  ;;  %s3031_s15 = smov %s2481_s16 }
 0x20b   : > { %s3032_s16 = smov %s3034_s28  ;;  %19 = sbr.rel (!%p17_p5) target bundleno = 7 (0x7), region = 85 }
 0x212   :  { %1605 = vsyncpa [#allocation3], 1 }
 0x213   :  { %1607 = vsyncpa [#allocation3 + $0x1], 1 }
 0x214   :  { %1608 = vsyncpa [#allocation6], 1 }
 0x215   :  { %1609 = vsyncpa [#allocation4], 1 }
 0x216   :  { %1611 = vsyncpa [#allocation4 + $0x1], 1 }

</bundles_post_ra>
